<compile_context>
chip_gen: v6e
topology: v6e:2x2x1
jax: 0.10.0
libtpu: 0.0.40
codegen_flags: <defaults>
</compile_context>

<pallas_src>
import jax
import jax.numpy as jnp
from jax.experimental import pallas as pl
from jax.experimental.pallas import tpu as pltpu


def _round_up(x, m):
    return (x + m - 1) // m * m


def _embed_kernel(x_ref, w_ref, b_ref, o_ref):
    # x_ref: (TM, K) bf16   w_ref: (K, E_pad) bf16
    # b_ref: (1, E_pad) f32 o_ref: (TM, E_pad) f32
    acc = jnp.dot(x_ref[...], w_ref[...], preferred_element_type=jnp.float32)
    o_ref[...] = (acc + b_ref[...]).astype(o_ref.dtype)


def cnn_embedding_forward(x, weight, bias, patch_size, embed_dim, tile_m=512):
    """x: (B, num_images, P, P) float32
    weight: (embed_dim, 1, P, P)  bias: (embed_dim,)
    returns: (B, num_images, embed_dim) float32"""
    B, N, H, W = x.shape
    assert H == W == patch_size, "Patch size mismatch"

    M = B * N
    K = patch_size * patch_size
    E = embed_dim

    # Glue: flatten patches / weights (plain JAX, matches PyTorch (C=1,H,W)
    # row-major weight flattening). bf16 inputs, f32 accumulation in-kernel.
    x2d = x.reshape(M, K).astype(jnp.bfloat16)          # (M, K)
    w2d = weight.reshape(E, K).T.astype(jnp.bfloat16)   # (K, E)
    b2d = bias.reshape(1, E).astype(jnp.float32)        # (1, E)

    # Lane-dense output: pad E up to a multiple of 128.
    E_pad = _round_up(E, 128)
    if E_pad != E:
        w2d = jnp.pad(w2d, ((0, 0), (0, E_pad - E)))
        b2d = jnp.pad(b2d, ((0, 0), (0, E_pad - E)))

    # M tiling: TM multiple of 16 (bf16 sublane packing); pad M up so the
    # grid divides evenly (no OOB / garbage-tail reads).
    M_pad = _round_up(M, 16)
    TM = min(tile_m, M_pad)
    M_pad = _round_up(M_pad, TM)
    if M_pad != M:
        x2d = jnp.pad(x2d, ((0, M_pad - M), (0, 0)))

    grid = (M_pad // TM,)

    out2d = pl.pallas_call(
        _embed_kernel,
        out_shape=jax.ShapeDtypeStruct((M_pad, E_pad), jnp.float32),
        grid=grid,
        in_specs=[
            pl.BlockSpec((TM, K), lambda i: (i, 0)),      # x tile: streams over M
            pl.BlockSpec((K, E_pad), lambda i: (0, 0)),   # weight: resident
            pl.BlockSpec((1, E_pad), lambda i: (0, 0)),   # bias: resident
        ],
        out_specs=pl.BlockSpec((TM, E_pad), lambda i: (i, 0)),
        compiler_params=pltpu.CompilerParams(
            dimension_semantics=("parallel",),
            vmem_limit_bytes=64 * 1024 * 1024,
        ),
        cost_estimate=pl.CostEstimate(
            flops=2 * M_pad * K * E_pad,
            bytes_accessed=2 * M_pad * K + 2 * K * E_pad
            + 4 * M_pad * E_pad + 4 * E_pad,
            transcendentals=0,
        ),
    )(x2d, w2d, b2d)

    return out2d[:M, :E].reshape(B, N, E)


if __name__ == "__main__":
    patch_size = 16
    embed_dim = 32
    B, num_images = 2, 8

    key = jax.random.PRNGKey(0)
    kx, kw, kb = jax.random.split(key, 3)

    # Deterministic synthetic parameters matching nn.Conv2d shapes.
    weight = jax.random.normal(kw, (embed_dim, 1, patch_size, patch_size),
                               dtype=jnp.float32) * 0.02
    bias = jax.random.normal(kb, (embed_dim,), dtype=jnp.float32) * 0.01

    x = jax.random.normal(kx, (B, num_images, patch_size, patch_size),
                          dtype=jnp.float32)

    out = cnn_embedding_forward(x, weight, bias, patch_size, embed_dim)
    out = jax.block_until_ready(out)

    # Pure-JAX f32 reference (conv-as-matmul identity); bf16 inputs in the
    # kernel -> use bf16-appropriate tolerance.
    ref = (x.reshape(B * num_images, -1)
           @ weight.reshape(embed_dim, -1).T + bias).reshape(B, num_images, embed_dim)
    assert out.shape == (B, num_images, embed_dim)
    assert jnp.allclose(out, ref, atol=2e-2, rtol=2e-2)

    print("KERNEL_OK")
</pallas_src>

<mosaic_0001>
module attributes {stable_mosaic.version = 11 : i64} {
  func.func @_embed_kernel(%arg0: i32, %arg1: memref<16x256xbf16, #tpu.memory_space<vmem>>, %arg2: memref<256x128xbf16, #tpu.memory_space<vmem>>, %arg3: memref<1x128xf32, #tpu.memory_space<vmem>>, %arg4: memref<16x128xf32, #tpu.memory_space<vmem>>) attributes {dimension_semantics = [#tpu.dimension_semantics<parallel>], iteration_bounds = array<i64: 1>, scalar_prefetch = 0 : i64, scratch_operands = 0 : i64, tpu.core_type = #tpu.core_type<tc>, window_params = [{transform_indices = @transform_0, window_bounds = array<i64: 16, 256>}, {pipeline_mode = #tpu.pipeline_mode<synchronous>, transform_indices = @transform_1, window_bounds = array<i64: 256, 128>}, {pipeline_mode = #tpu.pipeline_mode<synchronous>, transform_indices = @transform_2, window_bounds = array<i64: 1, 128>}, {transform_indices = @transform_3, window_bounds = array<i64: 16, 128>}]} {
    %c0 = arith.constant 0 : index
    %c0_0 = arith.constant 0 : index
    %0 = vector.load %arg1[%c0, %c0_0] : memref<16x256xbf16, #tpu.memory_space<vmem>>, vector<16x256xbf16>
    %c0_1 = arith.constant 0 : index
    %c0_2 = arith.constant 0 : index
    %1 = vector.load %arg2[%c0_1, %c0_2] : memref<256x128xbf16, #tpu.memory_space<vmem>>, vector<256x128xbf16>
    %cst = arith.constant dense<0.000000e+00> : vector<16x128xf32>
    %2 = tpu.matmul %0, %1, %cst {dimension_numbers = #tpu.dot_dimension_numbers<[1], [0], [0], [1], [0, 0, 1, 1], [], []>} : vector<16x256xbf16>, vector<256x128xbf16>, vector<16x128xf32> -> vector<16x128xf32>
    %c0_3 = arith.constant 0 : index
    %c0_4 = arith.constant 0 : index
    %3 = vector.load %arg3[%c0_3, %c0_4] : memref<1x128xf32, #tpu.memory_space<vmem>>, vector<1x128xf32>
    %4 = vector.broadcast %3 : vector<1x128xf32> to vector<16x128xf32>
    %5 = arith.addf %2, %4 : vector<16x128xf32>
    %c0_5 = arith.constant 0 : index
    %c0_6 = arith.constant 0 : index
    %6 = vector.load %arg4[%c0_5, %c0_6] : memref<16x128xf32, #tpu.memory_space<vmem>>, vector<16x128xf32>
    tpu.vector_store %arg4[%c0_5, %c0_6], %5 {strides = array<i32>} : memref<16x128xf32, #tpu.memory_space<vmem>>, vector<16x128xf32>,
    return
  }
  func.func @transform_0(%arg0: i32) -> (i32, i32) {
    %c0_i32 = arith.constant 0 : i32
    %c0_i32_0 = arith.constant 0 : i32
    return %arg0, %c0_i32 : i32, i32
  }
  func.func @transform_1(%arg0: i32) -> (i32, i32) {
    %c0_i32 = arith.constant 0 : i32
    %c0_i32_0 = arith.constant 0 : i32
    %c0_i32_1 = arith.constant 0 : i32
    return %c0_i32, %c0_i32_0 : i32, i32
  }
  func.func @transform_2(%arg0: i32) -> (i32, i32) {
    %c0_i32 = arith.constant 0 : i32
    %c0_i32_0 = arith.constant 0 : i32
    %c0_i32_1 = arith.constant 0 : i32
    return %c0_i32, %c0_i32_0 : i32, i32
  }
  func.func @transform_3(%arg0: i32) -> (i32, i32) {
    %c0_i32 = arith.constant 0 : i32
    %c0_i32_0 = arith.constant 0 : i32
    return %arg0, %c0_i32 : i32, i32
  }
}

</mosaic_0001>

<bundles_post_ra>
// kernel: tpu_custom_call.1
= control target key start
LH: loop header
LB: loop body
LE: loop exit
PB: predicated region body
PF: predicated region fallthrough
CT: control target
= control target key end

     0   :  { %8 = vsyncpa [#allocation3], 0  ;;  %s430_s0 = inlined_call_operand.hbm [shape: bf16[16,256], index: 0, kind: input, shape index: {}]   ;;  %s431_s1 = inlined_call_operand.hbm [shape: bf16[256,128], index: 1, kind: input, shape index: {}]   ;;  %s432_s2 = inlined_call_operand.vmem [shape: f32[1,128], index: 2, kind: input, shape index: {}]   ;;  %s433_s3 = inlined_call_operand.hbm [shape: f32[16,128], index: 3, kind: output, shape index: {}]  }
   0x1   :  { %9 = vsyncpa [#allocation6], 0 }
   0x2   :  { %10 = vsyncpa [#allocation4], 0  ;;  %s385_s12 = smov [#allocation2]  }
   0x3   :  { %s16_s13 = sshll.u32 %s385_s12, 4  ;;  %s17_s13 = int_to_ptr.vmem [resolvable:$true] %s16_s13 }
   0x4   :  { %s327_s14 = scalar_lea.vmem %s17_s13, 256  ;;  %p332_p1 = scmp.lt.s32.totalorder %s17_s13, %s17_s13 }
   0x5   :  { %p328_p0 = scmp.ne.s32.totalorder %s17_s13, %s327_s14  ;;  %p333_p2 = scmp.lt.s32.totalorder %s327_s14, %s327_s14 }
   0x7   :  { %p334_p3 = por %p333_p2, %p332_p1 }
   0x9   :  { %p335_p4 = pnand %p334_p3, %p328_p0 }
   0xb   :  { %338 = shalt.err (!%p335_p4)
}
   0xc   :  { %s386_s15 = smov 128   ;;  %s387_s16 = smov 8  }
   0xd   :  { %22 = dma.hbm_to_vmem [thread:$0]  %s430_s0, 256, %s17_s13, [#allocation3], %s386_s15, %s386_s15, %s387_s16  }
   0xe   :  { %s388_s19 = smov [#allocation5]  }
   0xf   :  { %s28_s20 = sshll.u32 %s388_s19, 4  ;;  %s29_s20 = int_to_ptr.vmem [resolvable:$true] %s28_s20 }
  0x10   :  { %s347_s21 = scalar_lea.vmem %s29_s20, 2048  ;;  %p352_p6 = scmp.lt.s32.totalorder %s29_s20, %s29_s20 }
  0x11   :  { %p348_p5 = scmp.ne.s32.totalorder %s29_s20, %s347_s21  ;;  %p353_p7 = scmp.lt.s32.totalorder %s347_s21, %s347_s21 }
  0x13   :  { %p354_p8 = por %p353_p7, %p352_p6 }
  0x15   :  { %p355_p9 = pnand %p354_p8, %p348_p5 }
  0x17   :  { %358 = shalt.err (!%p355_p9)
}
  0x18   :  { %s389_s22 = smov 64   ;;  %s390_s23 = smov 4  }
  0x19   :  { %34 = dma.hbm_to_vmem [thread:$0]  %s431_s1, 2048, %s29_s20, [#allocation6], %s389_s22, %s389_s22, %s390_s23  }
  0x1a   :  { %379 = dma.done.wait [#allocation3], 256  }
  0x1b   :  { %380 = vsyncadd [#allocation3], 4294967040 }
  0x1c   :  { %381 = dma.done.wait [#allocation6], 2048  }
  0x1d   :  { %382 = vsyncadd [#allocation6], 4294965248  ;;  %v300_v0 = vld [vmem:[#allocation5 + $0x78] sm:$0xff]   ;;  %v302_v2 = vld [vmem:[#allocation5 + $0x70] sm:$0xff]   ;;  %s391_s26 = smov [#allocation7]  }
  0x1e   :  { %v301_v1 = vld [vmem:[#allocation5 + $0x38] sm:$0xff]   ;;  %271 = vmatprep.subr.bf16.mxu0 %v300_v0  ;;  %v303_v3 = vld [vmem:[#allocation5 + $0x30] sm:$0xff]   ;;  %v304_v4 = vld [vmem:[#allocation5 + $0x68] sm:$0xff]   ;;  %s239_s27 = sshll.u32 %s391_s26, 4  ;;  %s240_s27 = int_to_ptr.vmem [resolvable:$true] %s239_s27 }
  0x1f   :  { %272 = vmatpush3.bf16.msra.mxu0 %v301_v1  ;;  %v305_v5 = vld [vmem:[#allocation5 + $0x28] sm:$0xff]   ;;  %v306_v6 = vld [vmem:[#allocation5 + $0x60] sm:$0xff]   ;;  %v308_v8 = vld [vmem:[#allocation5 + $0x58] sm:$0xff]   ;;  %s359_s28 = scalar_lea.vmem %s240_s27, 256  ;;  %p364_p11 = scmp.lt.s32.totalorder %s240_s27, %s240_s27 }
  0x20   :  { %273 = vmatprep.subr.bf16.mxu0 %v302_v2  ;;  %v307_v7 = vld [vmem:[#allocation5 + $0x20] sm:$0xff]   ;;  %v309_v9 = vld [vmem:[#allocation5 + $0x18] sm:$0xff]   ;;  %v310_v10 = vld [vmem:[#allocation5 + $0x50] sm:$0xff]   ;;  %p360_p10 = scmp.ne.s32.totalorder %s240_s27, %s359_s28  ;;  %p365_p12 = scmp.lt.s32.totalorder %s359_s28, %s359_s28 }
  0x21   :  { %v318_v11 = vld [vmem:[#allocation2 + $0x4] ss:$8 sps:$4 sm:$0xff]   ;;  %v312_v13 = vld [vmem:[#allocation5 + $0x48] sm:$0xff]   ;;  %v314_v15 = vld [vmem:[#allocation5 + $0x40] sm:$0xff]  }
  0x22   :  { %v311_v12 = vld [vmem:[#allocation5 + $0x10] sm:$0xff]   ;;  %223 = vmatprep.mubr.bf16.mxu0 %v318_v11  ;;  %v313_v14 = vld [vmem:[#allocation5 + $0x8] sm:$0xff]   ;;  %v315_v16 = vld [vmem:[#allocation5] sm:$0xff]   ;;  %p366_p13 = por %p365_p12, %p364_p11 }
  0x23   :  { %274 = vmatpush3.bf16.msra.mxu0 %v303_v3  ;;  %v316_v17 = vld [vmem:[#allocation2] ss:$8 sps:$4 sm:$0xff]  }
  0x24   :  { %275 = vmatprep.subr.bf16.mxu0 %v304_v4  ;;  %v252_v19 = vld [vmem:[%s432_s2] ss:$0 sm:$0xff]  ;;  %p367_p0 = pnand %p366_p13, %p360_p10 }
  0x27   :  { %276 = vmatpush3.bf16.msra.mxu0 %v305_v5 }
  0x28   :  { %277 = vmatprep.subr.bf16.mxu0 %v306_v6 }
  0x2b   :  { %278 = vmatpush3.bf16.msra.mxu0 %v307_v7 }
  0x2c   :  { %279 = vmatprep.subr.bf16.mxu0 %v308_v8 }
  0x2f   :  { %280 = vmatpush3.bf16.msra.mxu0 %v309_v9 }
  0x30   :  { %281 = vmatprep.subr.bf16.mxu0 %v310_v10 }
  0x33   :  { %282 = vmatpush3.bf16.msra.mxu0 %v311_v12 }
  0x34   :  { %283 = vmatprep.subr.bf16.mxu0 %v312_v13 }
  0x37   :  { %284 = vmatpush3.bf16.msra.mxu0 %v313_v14 }
  0x38   :  { %285 = vmatprep.subr.bf16.mxu0 %v314_v15 }
  0x3b   :  { %286 = vmatpush3.bf16.msra.mxu0 %v315_v16 }
  0x3e   :  { %224 = vmatmul.mubr.bf16.vlgmr.msra.gmra.mxu0 %v316_v17 }
  0xfe   :  { %v287_v18 = vpop.f32.mrf.mxu0 }
 0x100   :  { %v288_v20 = vpop.f32.mrf.mxu0 }
 0x101   :  { %v289_v21 = vadd.f32 %v288_v20, %v287_v18 }
 0x102   :  { %v290_v22 = vpop.f32.mrf.mxu0 }
 0x103   :  { %v226_v23 = vadd.f32 %v289_v21, %v252_v19 }
 0x104   :  { %v291_v24 = vpop.f32.mrf.mxu0 }
 0x105   :  { %232 = vst [vmem:[#allocation7] sm:$0xff] %v226_v23  ;;  %v292_v25 = vadd.f32 %v291_v24, %v290_v22 }
 0x107   :  { %v229_v26 = vadd.f32 %v292_v25, %v252_v19 }
 0x109   :  { %233 = vst [vmem:[#allocation7 + $0x8] sm:$0xff] %v229_v26 }
 0x10a   :  { %370 = shalt.err (!%p367_p0)
}
 0x10b   :  { %245 = dma.vmem_to_hbm [thread:$0]  %s240_s27, 256, %s433_s3, [#allocation4], %s386_s15, %s386_s15, %s387_s16  }
 0x10c   :  { %383 = dma.done.wait [#allocation4], 256  }
 0x10d   :  { %384 = vsyncadd [#allocation4], 4294967040 }
 0x10e   :  { %249 = vsyncpa [#allocation3], 1 }
 0x10f   :  { %250 = vsyncpa [#allocation6], 1 }
 0x110   :  { %251 = vsyncpa [#allocation4], 1 }

</bundles_post_ra>
